<compile_context>
chip_gen: v6e
topology: v6e:2x2x1
jax: 0.10.0
libtpu: 0.0.40
codegen_flags: <defaults>
</compile_context>

<pallas_src>
import jax
import jax.numpy as jnp
from jax import lax
from jax.experimental import pallas as pl
from jax.experimental.pallas import tpu as pltpu


def _round_up(v: int, m: int) -> int:
    return (v + m - 1) // m * m


def _cdiv(a: int, b: int) -> int:
    return (a + b - 1) // b


def _vmem_budget_bytes() -> int:
    """Generation-aware scoped-VMEM budget (headroom below physical)."""
    try:
        cap = int(pltpu.get_tpu_info().vmem_capacity_bytes)
    except Exception:
        cap = 64 << 20
    # ~64 MiB on 128-MiB parts (v5e/v6e), ~48 MiB on 64-MiB parts (v7x).
    return max(16 << 20, min((cap * 3) // 4, 64 << 20))


# ------------------- phase 1: BN stats + bf16 padded x ------------------------

def _make_bn_stats_kernel(*, n, tm, n_inner, pad_lanes, mask_rows, xpad_dtype):
    def kernel(x_ref, stats_ref, xpad_ref):
        # stats_ref (1, 2, d_in_p): per-core resident accumulator (rows: sum, sumsq).
        @pl.when(pl.program_id(1) == 0)
        def _init():
            stats_ref[...] = jnp.zeros_like(stats_ref)

        xf = x_ref[...].astype(jnp.float32)                    # (tm, d_in) f32
        if mask_rows:
            # Zero rows past the true batch size (partial / overhanging tiles).
            tile = pl.program_id(0) * n_inner + pl.program_id(1)
            rows = tile * tm + lax.broadcasted_iota(jnp.int32, (tm, 1), 0)
            xf = jnp.where(rows < n, xf, 0.0)
        if pad_lanes:
            # Lane-dense 128-wide tile; padded lanes are exact zeros.
            xf = jnp.concatenate(
                [xf, jnp.zeros((xf.shape[0], pad_lanes), jnp.float32)], axis=1)

        # Accumulate rows directly (no cross-sublane concat in the hot loop).
        s = jnp.sum(xf, axis=0, keepdims=True)                 # (1, d_in_p)
        ss = jnp.sum(xf * xf, axis=0, keepdims=True)           # (1, d_in_p)
        stats_ref[:, 0:1, :] += s[None]
        stats_ref[:, 1:2, :] += ss[None]

        xpad_ref[...] = xf.astype(xpad_dtype)                  # lane-dense store

    return kernel


# --------------- phase 2: fused BN-folded linear0 + ReLU + linear1 ------------

def _fused_block_kernel(x_ref, w0_ref, b0_ref, w1_ref, b1_ref, o_ref, acc_ref):
    # x_ref : (tm, d_in_p)     bf16
    # w0_ref: (d_in_p, tk_d)   bf16 (BN scale folded in)
    # b0_ref: (1, tk_d)        f32  (BN shift folded in)
    # w1_ref: (tk_d, d_in_p)   bf16
    # b1_ref: (1, d_in_p)      f32
    # acc_ref: (tm, d_in_p)    f32 scratch accumulator over hidden chunks
    k = pl.program_id(1)

    @pl.when(k == 0)
    def _init():
        acc_ref[...] = jnp.zeros_like(acc_ref)

    h = jnp.dot(x_ref[...], w0_ref[...], preferred_element_type=jnp.float32)
    h = jnp.maximum(h + b0_ref[...], 0.0)          # ReLU (dropout == identity)
    acc_ref[...] += jnp.dot(h.astype(w1_ref.dtype), w1_ref[...],
                            preferred_element_type=jnp.float32)

    @pl.when(k == pl.num_programs(1) - 1)
    def _store():
        o_ref[...] = (acc_ref[...] + b1_ref[...]).astype(o_ref.dtype)


# ----------------------------------- wrapper ----------------------------------

def residual_block_forward(x, gamma, beta, w0_t, b0, w1_t, b1, *,
                           block_rows=1024, compute_dtype=jnp.bfloat16,
                           out_dtype=jnp.bfloat16, eps=1e-5):
    """x: (N, d_in); w0_t: (d_in, d); w1_t: (d, d_in); 1-D gamma/beta/biases."""
    n, d_in = x.shape
    d = w0_t.shape[1]
    d_in_p = _round_up(d_in, 128)                  # lane-dense feature dims
    d_p = _round_up(d, 128)

    # Batch tile: multiple of 16 (bf16 sublane packing); cap at ceil(n/2) so the
    # "parallel" batch axis has >= 2 tiles (keeps both v7x TensorCores busy).
    if n >= 16:
        tm = max(16, min(_round_up(block_rows, 16), _round_up(_cdiv(n, 2), 16)))
    else:
        tm = n                                     # single tile == full array

    budget = _vmem_budget_bytes()
    c_item = jnp.dtype(compute_dtype).itemsize
    o_item = jnp.dtype(out_dtype).itemsize

    def _p2_need(tm_, tk_):                        # rough phase-2 VMEM estimate
        return (2 * tm_ * d_in_p * c_item          # x tile (double-buffered)
                + 2 * tm_ * d_in_p * o_item        # out tile (double-buffered)
                + tm_ * d_in_p * 4                 # f32 output accumulator
                + tm_ * tk_ * 4                    # f32 hidden intermediate
                + 2 * 2 * tk_ * d_in_p * c_item    # W0/W1 chunks (double-buffered)
                + 4 * (tk_ + d_in_p) * 4)          # biases

    # Hidden-dim chunk: bounds the f32 intermediate & streamed weight slices.
    tk_d = min(d_p, 512)
    while _p2_need(tm, tk_d) > budget and tk_d > 128:
        tk_d = max(128, _round_up(tk_d // 2, 128))
    while _p2_need(tm, tk_d) > budget and tm > 16:
        tm = max(16, _round_up(tm // 2, 16))
    d_p2 = _round_up(d_p, tk_d)

    n_tiles = _cdiv(n, tm)
    ncs = 2 if n_tiles >= 2 else 1                 # per-core stats partials (v7x)
    n_inner = _cdiv(n_tiles, ncs)
    n_pad = ncs * n_inner * tm                     # rows of x_pad / padded output
    mask_rows = (n_pad != n)
    last_tile = n_tiles - 1

    if ncs * n_inner == n_tiles:
        x_index_map = lambda c, j: (c * n_inner + j, 0)
    else:
        # Clamp so no input block starts past the end of x; the overhanging
        # grid step is fully masked to zero inside the kernel.
        x_index_map = lambda c, j: (jnp.minimum(c * n_inner + j, last_tile), 0)

    stats_kernel = _make_bn_stats_kernel(
        n=n, tm=tm, n_inner=n_inner, pad_lanes=d_in_p - d_in,
        mask_rows=mask_rows, xpad_dtype=compute_dtype)

    # ---- phase 1: full-batch f32 statistics + bf16 lane-padded activations ----
    stats, x_pad = pl.pallas_call(
        stats_kernel,
        out_shape=(jax.ShapeDtypeStruct((ncs, 2, d_in_p), jnp.float32),
                   jax.ShapeDtypeStruct((n_pad, d_in_p), compute_dtype)),
        grid=(ncs, n_inner),
        in_specs=[pl.BlockSpec((tm, d_in), x_index_map)],
        out_specs=(
            pl.BlockSpec((1, 2, d_in_p), lambda c, j: (c, 0, 0)),       # per-core acc
            pl.BlockSpec((tm, d_in_p), lambda c, j: (c * n_inner + j, 0)),
        ),
        compiler_params=pltpu.CompilerParams(
            dimension_semantics=("parallel", "arbitrary"),
            vmem_limit_bytes=int(budget)),
    )(x)

    # ---- fold BN (batch mean, biased var, affine) into linear0 ---------------
    totals = jnp.sum(stats, axis=0)                            # (2, d_in_p) f32
    inv_n = 1.0 / float(n)
    mean = totals[0] * inv_n
    var = jnp.maximum(totals[1] * inv_n - mean * mean, 0.0)
    gamma_p = jnp.pad(gamma.astype(jnp.float32), (0, d_in_p - d_in))
    beta_p = jnp.pad(beta.astype(jnp.float32), (0, d_in_p - d_in))
    scale = gamma_p * lax.rsqrt(var + eps)                     # (d_in_p,)
    shift = beta_p - mean * scale

    w0_p = jnp.pad(w0_t.astype(jnp.float32), ((0, d_in_p - d_in), (0, d_p2 - d)))
    b0_p = jnp.pad(b0.astype(jnp.float32), (0, d_p2 - d))
    w1_p = jnp.pad(w1_t.astype(jnp.float32), ((0, d_p2 - d), (0, d_in_p - d_in)))
    b1_p = jnp.pad(b1.astype(jnp.float32), (0, d_in_p - d_in))

    w0_eff = (w0_p * scale[:, None]).astype(compute_dtype)     # (d_in_p, d_p2)
    b0_eff = (shift @ w0_p + b0_p).reshape(1, d_p2)            # f32
    w1_c = w1_p.astype(compute_dtype)                          # (d_p2, d_in_p)
    b1_c = b1_p.reshape(1, d_in_p)                             # f32

    # ---- phase 2: fused (BN-folded) linear0 + ReLU + linear1 -----------------
    out_pad = pl.pallas_call(
        _fused_block_kernel,
        out_shape=jax.ShapeDtypeStruct((n_pad, d_in_p), out_dtype),
        grid=(n_pad // tm, d_p2 // tk_d),
        in_specs=[
            pl.BlockSpec((tm, d_in_p), lambda i, k: (i, 0)),    # x tile
            pl.BlockSpec((d_in_p, tk_d), lambda i, k: (0, k)),  # W0_eff chunk
            pl.BlockSpec((1, tk_d), lambda i, k: (0, k)),       # b0_eff chunk
            pl.BlockSpec((tk_d, d_in_p), lambda i, k: (k, 0)),  # W1 chunk
            pl.BlockSpec((1, d_in_p), lambda i, k: (0, 0)),     # b1 (resident)
        ],
        out_specs=pl.BlockSpec((tm, d_in_p), lambda i, k: (i, 0)),
        scratch_shapes=[pltpu.VMEM((tm, d_in_p), jnp.float32)],
        compiler_params=pltpu.CompilerParams(
            dimension_semantics=("parallel", "arbitrary"),
            vmem_limit_bytes=int(budget)),
    )(x_pad, w0_eff, b0_eff, w1_c, b1_c)

    # Slice padding off only when present; consumers that tolerate the padded
    # slab can slice lazily themselves to avoid the extra copy.
    if n_pad == n and d_in_p == d_in:
        return out_pad
    return out_pad[:n, :d_in]


# ------------------------------ params & reference ----------------------------

def init_params(key, d_in, d):
    """PyTorch-style uniform(+/- 1/sqrt(fan_in)) init; weights pre-transposed."""
    k0w, k0b, k1w, k1b = jax.random.split(key, 4)
    bound0 = 1.0 / jnp.sqrt(d_in)
    bound1 = 1.0 / jnp.sqrt(d)
    w0 = jax.random.uniform(k0w, (d, d_in), jnp.float32, -bound0, bound0)
    b0 = jax.random.uniform(k0b, (d,), jnp.float32, -bound0, bound0)
    w1 = jax.random.uniform(k1w, (d_in, d), jnp.float32, -bound1, bound1)
    b1 = jax.random.uniform(k1b, (d_in,), jnp.float32, -bound1, bound1)
    gamma = jnp.ones((d_in,), jnp.float32)
    beta = jnp.zeros((d_in,), jnp.float32)
    return gamma, beta, w0.T, b0, w1.T, b1


def reference_forward(x, gamma, beta, w0_t, b0, w1_t, b1, eps=1e-5):
    mean = jnp.mean(x, axis=0, keepdims=True)
    var = jnp.mean((x - mean) ** 2, axis=0, keepdims=True)
    z = (x - mean) * lax.rsqrt(var + eps) * gamma + beta
    h = jnp.maximum(z @ w0_t + b0, 0.0)
    return h @ w1_t + b1


if __name__ == "__main__":
    # Small, non-128-aligned features (exercise lane padding); enough rows for
    # a 2-tile batch grid (tm = 256) and the 2-way phase-1 core split.
    N, d_in, d = 512, 48, 96
    key = jax.random.PRNGKey(0)
    kx, kp = jax.random.split(key)
    x = jax.random.normal(kx, (N, d_in), jnp.float32)
    params = init_params(kp, d_in, d)

    out = residual_block_forward(x, *params)
    out = jax.block_until_ready(out)

    ref = reference_forward(x, *params)
    assert out.shape == (N, d_in)
    out_f32 = out.astype(jnp.float32)
    # bf16 matmul operands + bf16 output store (f32 accumulation) -> ~1e-2 error.
    err = jnp.max(jnp.abs(out_f32 - ref))
    assert jnp.allclose(out_f32, ref, atol=5e-2, rtol=5e-2), (
        f"mismatch vs reference (max abs err {err})")

    print("KERNEL_OK")
</pallas_src>

<mosaic_0001>
module attributes {stable_mosaic.version = 11 : i64} {
  func.func @kernel(%arg0: i32, %arg1: i32, %arg2: memref<256x48xf32, #tpu.memory_space<vmem>>, %arg3: memref<1x2x128xf32, #tpu.memory_space<vmem>>, %arg4: memref<256x128xbf16, #tpu.memory_space<vmem>>) attributes {dimension_semantics = [#tpu.dimension_semantics<parallel>, #tpu.dimension_semantics<arbitrary>], iteration_bounds = array<i64: 2, 1>, scalar_prefetch = 0 : i64, scratch_operands = 0 : i64, tpu.core_type = #tpu.core_type<tc>, window_params = [{transform_indices = @transform_0, window_bounds = array<i64: 256, 48>}, {transform_indices = @transform_1, window_bounds = array<i64: 1, 2, 128>}, {transform_indices = @transform_2, window_bounds = array<i64: 256, 128>}]} {
    %c0_i32 = arith.constant 0 : i32
    %0 = arith.cmpi eq, %arg1, %c0_i32 : i32
    %1 = arith.extui %0 : i1 to i32
    %c0_i32_0 = arith.constant 0 : i32
    %2 = arith.cmpi ne, %1, %c0_i32_0 : i32
    scf.if %2 {
      %cst_17 = arith.constant 0.000000e+00 : f32
      %21 = vector.broadcast %cst_17 : f32 to vector<1x2x128xf32>
      %c0_18 = arith.constant 0 : index
      %c0_19 = arith.constant 0 : index
      %c0_20 = arith.constant 0 : index
      %22 = vector.load %arg3[%c0_18, %c0_19, %c0_20] : memref<1x2x128xf32, #tpu.memory_space<vmem>>, vector<1x2x128xf32>
      tpu.vector_store %arg3[%c0_18, %c0_19, %c0_20], %21 {strides = array<i32>} : memref<1x2x128xf32, #tpu.memory_space<vmem>>, vector<1x2x128xf32>,
    } else {
    }
    %c0 = arith.constant 0 : index
    %c0_1 = arith.constant 0 : index
    %3 = vector.load %arg2[%c0, %c0_1] : memref<256x48xf32, #tpu.memory_space<vmem>>, vector<256x48xf32>
    %cst = arith.constant 0.000000e+00 : f32
    %4 = vector.broadcast %cst : f32 to vector<256x80xf32>
    %5 = tpu.concatenate %3, %4 in 1 : vector<256x48xf32>, vector<256x80xf32> -> vector<256x128xf32>
    %cst_2 = arith.constant dense<0.000000e+00> : vector<128xf32>
    %6 = vector.multi_reduction <add>, %5, %cst_2 [0] : vector<256x128xf32> to vector<128xf32>
    %7 = vector.shape_cast %6 : vector<128xf32> to vector<1x128xf32>
    %8 = arith.mulf %5, %5 : vector<256x128xf32>
    %cst_3 = arith.constant dense<0.000000e+00> : vector<128xf32>
    %9 = vector.multi_reduction <add>, %8, %cst_3 [0] : vector<256x128xf32> to vector<128xf32>
    %10 = vector.shape_cast %9 : vector<128xf32> to vector<1x128xf32>
    %c0_4 = arith.constant 0 : index
    %c0_5 = arith.constant 0 : index
    %c0_6 = arith.constant 0 : index
    %11 = vector.load %arg3[%c0_4, %c0_5, %c0_6] : memref<1x2x128xf32, #tpu.memory_space<vmem>>, vector<1x1x128xf32>
    %12 = vector.shape_cast %7 : vector<1x128xf32> to vector<1x1x128xf32>
    %13 = arith.addf %11, %12 : vector<1x1x128xf32>
    %c0_7 = arith.constant 0 : index
    %c0_8 = arith.constant 0 : index
    %c0_9 = arith.constant 0 : index
    %14 = vector.load %arg3[%c0_7, %c0_8, %c0_9] : memref<1x2x128xf32, #tpu.memory_space<vmem>>, vector<1x1x128xf32>
    tpu.vector_store %arg3[%c0_7, %c0_8, %c0_9], %13 {strides = array<i32>} : memref<1x2x128xf32, #tpu.memory_space<vmem>>, vector<1x1x128xf32>,
    %c0_10 = arith.constant 0 : index
    %c1 = arith.constant 1 : index
    %c0_11 = arith.constant 0 : index
    %15 = vector.load %arg3[%c0_10, %c1, %c0_11] : memref<1x2x128xf32, #tpu.memory_space<vmem>>, vector<1x1x128xf32>
    %16 = vector.shape_cast %10 : vector<1x128xf32> to vector<1x1x128xf32>
    %17 = arith.addf %15, %16 : vector<1x1x128xf32>
    %c0_12 = arith.constant 0 : index
    %c1_13 = arith.constant 1 : index
    %c0_14 = arith.constant 0 : index
    %18 = vector.load %arg3[%c0_12, %c1_13, %c0_14] : memref<1x2x128xf32, #tpu.memory_space<vmem>>, vector<1x1x128xf32>
    tpu.vector_store %arg3[%c0_12, %c1_13, %c0_14], %17 {strides = array<i32>} : memref<1x2x128xf32, #tpu.memory_space<vmem>>, vector<1x1x128xf32>,
    %19 = arith.truncf %5 : vector<256x128xf32> to vector<256x128xbf16>
    %c0_15 = arith.constant 0 : index
    %c0_16 = arith.constant 0 : index
    %20 = vector.load %arg4[%c0_15, %c0_16] : memref<256x128xbf16, #tpu.memory_space<vmem>>, vector<256x128xbf16>
    tpu.vector_store %arg4[%c0_15, %c0_16], %19 {strides = array<i32>} : memref<256x128xbf16, #tpu.memory_space<vmem>>, vector<256x128xbf16>,
    return
  }
  func.func @transform_0(%arg0: i32, %arg1: i32) -> (i32, i32) {
    %c1_i32 = arith.constant 1 : i32
    %0 = arith.muli %arg0, %c1_i32 : i32
    %1 = arith.addi %0, %arg1 : i32
    %c0_i32 = arith.constant 0 : i32
    %c0_i32_0 = arith.constant 0 : i32
    return %1, %c0_i32 : i32, i32
  }
  func.func @transform_1(%arg0: i32, %arg1: i32) -> (i32, i32, i32) {
    %c0_i32 = arith.constant 0 : i32
    %c0_i32_0 = arith.constant 0 : i32
    %c0_i32_1 = arith.constant 0 : i32
    return %arg0, %c0_i32, %c0_i32_0 : i32, i32, i32
  }
  func.func @transform_2(%arg0: i32, %arg1: i32) -> (i32, i32) {
    %c1_i32 = arith.constant 1 : i32
    %0 = arith.muli %arg0, %c1_i32 : i32
    %1 = arith.addi %0, %arg1 : i32
    %c0_i32 = arith.constant 0 : i32
    %c0_i32_0 = arith.constant 0 : i32
    return %1, %c0_i32 : i32, i32
  }
}

</mosaic_0001>

<bundles_post_ra>
// kernel: tpu_custom_call.1
= control target key start
LH: loop header
LB: loop body
LE: loop exit
PB: predicated region body
PF: predicated region fallthrough
CT: control target
= control target key end

     0   :  { %8 = vsyncpa [#allocation3], 0  ;;  %s1448_s0 = inlined_call_operand.vmem [shape: f32[512,48], index: 0, kind: input, shape index: {}]   ;;  %s1449_s1 = inlined_call_operand.hbm [shape: f32[2,2,128], index: 1, kind: output, shape index: {0}]   ;;  %s1450_s2 = inlined_call_operand.hbm [shape: bf16[512,128], index: 2, kind: output, shape index: {1}]  }
   0x1   :  { %10 = vsyncpa [#allocation3 + $0x1], 0 }
   0x2   :  { %11 = vsyncpa [#allocation5], 0 }
   0x3   :  { %13 = vsyncpa [#allocation5 + $0x1], 0  ;;  %s1023_s9 = smov 0   ;;  %s1025_s10 = smov 0  }
   0x4   :  { %s1027_s11 = smov 0   ;;  %s1029_s12 = smov 0  }
   0x5   :  { %s1031_s13 = smov 0   ;;  %s1033_s14 = smov 0  }
   0x6 LB: > { %s656_s15 = sadd.s32 4294967295, %s1001_s14   ;;  %s657_s16 = sadd.s32 4294967294, %s1001_s14   ;;  %s1001_s14 = sphi %s1033_s14, %s19_s14   ;;  %s997_s13 = sphi %s1031_s13, %s1457_s13   ;;  %s993_s12 = sphi %s1029_s12, %s1456_s12   ;;  %s989_s11 = sphi %s1027_s11, %s1455_s11   ;;  %s985_s10 = sphi %s1025_s10, %s1454_s10   ;;  %s981_s9 = sphi %s1023_s9, %s1453_s9  }
   0x7   : > { %s31_s17 = sadd.s32 1, %s997_s13  ;;  %s66_s18 = sadd.s32 1, %s989_s11 }
   0x8   : > { %p33_p0 = scmp.ge.s32.totalorder %s31_s17, 2  ;;  %p76_p1 = scmp.ne.s32.totalorder %s989_s11, %s985_s10 }
   0x9   : > { %p77_p2 = scmp.eq.s32.totalorder %s656_s15, 1  ;;  %p82_p3 = scmp.ne.s32.totalorder %s985_s10, %s981_s9 }
   0xa   : > { %s1459_s17 = smov (%p33_p0, %s31_s17), 0  ;;  %p83_p5 = scmp.eq.s32.totalorder %s657_s16, 1 }
   0xb   : > { %p1063_p4 = por %p77_p2, %p76_p1  ;;  %s63_s20 = ssub.s32 %s997_s13, %s1459_s17 }
   0xc   : > { %p660_p6 = scmp.ge.s32.totalorder %s1001_s14, 1  ;;  %p64_p7 = scmp.eq.s32.totalorder %s63_s20, 0 }
   0xd   : > { %p1070_p8 = por %p83_p5, %p82_p3  ;;  %p140_p9 = scmp.lt.s32.totalorder %s1001_s14, 3 }
   0xe   : > { %s1076_s22 = scalar_select %p64_p7, %s989_s11, %s66_s18  }
   0xf   : > { %p141_p10 = pnand %p660_p6, %p140_p9 }
  0x10   : > { %s1079_s23 = sand.u32 (!%p141_p10), 1, %s985_s10   ;;  %s1083_s25 = sshll.u32 (!%p141_p10), %s993_s12, 5 }
  0x11   : > { %144 = sbr.rel (%p141_p10) target bundleno = 143 (0x8f), region = 24  ;;  %s661_s24 = sshll.u32 (!%p141_p10), %s1079_s23, 1 }
  0x12   : > { %s1085_s26 = scalar_lea.vmem (!%p141_p10), [#allocation2], %s661_s24  ;;  %p170_p11 = scmp.lt.s32.totalorder (!%p141_p10), %s1083_s25, 63 }
  0x13   : > { %s662_s4 = sshll.u32 (!%p141_p10), %s1079_s23, 7  ;;  %s736_s7 = sshll.u32 (!%p141_p10), %s993_s12, 11 }
  0x14   : > { %s1250_s5 = scalar_lea.vmem (!%p141_p10), [#allocation4], %s662_s4  ;;  %s1292_s15 = scalar_lea.hbm (!%p141_p10), %s1450_s2, %s736_s7 }
  0x15   : > { %s553_s6 = sshll.u32 (!%p141_p10), %s1250_s5, 4  ;;  %s526_s16 = scalar_lea.sflag (!%p141_p10), [#allocation5], %s1079_s23  ;;  %s1278_s6 = int_to_ptr.vmem [resolvable:$true] %s553_s6 }
  0x16   : > { %v1003_v0 = vmov 0.0   ;;  %s171_s27 = scalar_select %p170_p11, %s1083_s25, 63  ;;  %vm215_vm0 = vcmask 392192  }
  0x17   : > { %182 = vst [vmem:[%s1085_s26] sm:$0x3] %v1003_v0  ;;  %s895_s18 = scalar_lea.vmem %s1278_s6, 2048  ;;  %s1004_s20 = smov [#allocation4]  }
  0x18   : > { %s664_s28 = sshll.u32 %s171_s27, 3  ;;  %p896_p12 = scmp.ne.s32.totalorder %s1278_s6, %s895_s18 }
  0x19   : > { %s1093_s3 = scalar_lea.vmem %s1448_s0, %s664_s28  ;;  %s899_s24 = sshll.u32 %s1004_s20, 4  ;;  %s900_s24 = int_to_ptr.vmem [resolvable:$false] %s899_s24 }
  0x1a   : > { %v183_v1 = vld [vmem:[%s1093_s3] sm:$0xff]  ;;  %v184_v2 = vld [vmem:[%s1093_s3 + $0x8] sm:$0xff]  ;;  %v185_v3 = vld [vmem:[%s1093_s3 + $0x10] sm:$0xff]  ;;  %p897_p13 = pnand %p896_p12, %p1063_p4  ;;  %s901_s27 = scalar_lea.vmem %s900_s24, 4096 }
  0x1b   : > { %v1099_v4 = vsel %vm215_vm0, %v183_v1, 0.0  ;;  %v1102_v5 = vsel %vm215_vm0, %v184_v2, 0.0  ;;  %v186_v6 = vld [vmem:[%s1093_s3 + $0x18] sm:$0xff]  ;;  %v1108_v8 = vsel %vm215_vm0, %v185_v3, 0.0  ;;  %v187_v9 = vld [vmem:[%s1093_s3 + $0x20] sm:$0xff]  ;;  %v188_v12 = vld [vmem:[%s1093_s3 + $0x28] sm:$0xff]  ;;  %p902_p1 = scmp.lt.s32.totalorder %s1278_s6, %s900_s24  ;;  %p903_p2 = scmp.lt.s32.totalorder %s901_s27, %s895_s18 }
  0x1c   : > { %v248_v7 = vadd.f32 %v1102_v5, %v1099_v4  ;;  %v1113_v11 = vsel %vm215_vm0, %v186_v6, 0.0  ;;  %v189_v14 = vld [vmem:[%s1093_s3 + $0x30] sm:$0xff]  ;;  %v190_v15 = vld [vmem:[%s1093_s3 + $0x38] sm:$0xff]  ;;  %v1120_v16 = vsel %vm215_vm0, %v187_v9, 0.0  ;;  %v191_v17 = vld [vmem:[%s1093_s3 + $0x40] sm:$0xff]  ;;  %v1130_v24 = vsel %vm215_vm0, %v188_v12, 0.0  ;;  %p898_p0 = pneg %p897_p13 }
  0x1d   : > { %v192_v18 = vld [vmem:[%s1093_s3 + $0x48] sm:$0xff]  ;;  %v193_v19 = vld [vmem:[%s1093_s3 + $0x50] sm:$0xff]  ;;  %v194_v21 = vld [vmem:[%s1093_s3 + $0x58] sm:$0xff]  ;;  %v1137_v28 = vsel %vm215_vm0, %v189_v14, 0.0  ;;  %v1140_v29 = vsel %vm215_vm0, %v190_v15, 0.0  ;;  %v1147_v34 = vsel %vm215_vm0, %v191_v17, 0.0  ;;  %v285_v37 = vmul.f32 %v1099_v4, %v1099_v4  ;;  %p904_p3 = por %p903_p2, %p902_p1 }
  0x1e   : > { %v249_v10 = vadd.f32 %v248_v7, %v1108_v8  ;;  %v195_v22 = vld [vmem:[%s1093_s3 + $0x60] sm:$0xff]  ;;  %v196_v23 = vld [vmem:[%s1093_s3 + $0x68] sm:$0xff]  ;;  %v197_v25 = vld [vmem:[%s1093_s3 + $0x70] sm:$0xff]  ;;  %v1150_v35 = vsel %vm215_vm0, %v192_v18, 0.0  ;;  %v1153_v36 = vsel %vm215_vm0, %v193_v19, 0.0  ;;  %v1161_v41 = vsel %vm215_vm0, %v194_v21, 0.0 }
  0x1f   : > { %v198_v26 = vld [vmem:[%s1093_s3 + $0x78] sm:$0xff]  ;;  %v199_v27 = vld [vmem:[%s1093_s3 + $0x80] sm:$0xff]  ;;  %v200_v31 = vld [vmem:[%s1093_s3 + $0x88] sm:$0xff]  ;;  %v1164_v42 = vsel %vm215_vm0, %v195_v22, 0.0  ;;  %v1167_v43 = vsel %vm215_vm0, %v196_v23, 0.0  ;;  %v1174_v48 = vsel %vm215_vm0, %v197_v25, 0.0  ;;  %v286_v51 = vmul.f32 %v1102_v5, %v1102_v5  ;;  %p905_p5 = pnand %p904_p3, %p898_p0 }
  0x20   : > { %v250_v13 = vadd.f32 %v249_v10, %v1113_v11  ;;  %v201_v32 = vld [vmem:[%s1093_s3 + $0x90] sm:$0xff]  ;;  %v202_v33 = vld [vmem:[%s1093_s3 + $0x98] sm:$0xff]  ;;  %v203_v38 = vld [vmem:[%s1093_s3 + $0xa0] sm:$0xff]  ;;  %v1177_v49 = vsel %vm215_vm0, %v198_v26, 0.0  ;;  %v1180_v50 = vsel %vm215_vm0, %v199_v27, 0.0  ;;  %v1188_v55 = vsel %vm215_vm0, %v200_v31, 0.0 }
  0x21   : > { %v204_v39 = vld [vmem:[%s1093_s3 + $0xa8] sm:$0xff]  ;;  %v205_v40 = vld [vmem:[%s1093_s3 + $0xb0] sm:$0xff]  ;;  %v206_v45 = vld [vmem:[%s1093_s3 + $0xb8] sm:$0xff]  ;;  %v1191_v56 = vsel %vm215_vm0, %v201_v32, 0.0  ;;  %v1194_v57 = vsel %vm215_vm0, %v202_v33, 0.0  ;;  %v1201_v62 = vsel %vm215_vm0, %v203_v38, 0.0  ;;  %v287_v1 = vmul.f32 %v1108_v8, %v1108_v8 }
  0x22   : > { %v251_v20 = vadd.f32 %v250_v13, %v1120_v16  ;;  %v207_v46 = vld [vmem:[%s1093_s3 + $0xc0] sm:$0xff]  ;;  %v208_v47 = vld [vmem:[%s1093_s3 + $0xc8] sm:$0xff]  ;;  %v209_v52 = vld [vmem:[%s1093_s3 + $0xd0] sm:$0xff]  ;;  %v1204_v63 = vsel %vm215_vm0, %v204_v39, 0.0  ;;  %v1207_v0 = vsel %vm215_vm0, %v205_v40, 0.0  ;;  %v1212_v2 = vsel %vm215_vm0, %v206_v45, 0.0 }
  0x23   : > { %v210_v53 = vld [vmem:[%s1093_s3 + $0xd8] sm:$0xff]  ;;  %v211_v54 = vld [vmem:[%s1093_s3 + $0xe0] sm:$0xff]  ;;  %v212_v59 = vld [vmem:[%s1093_s3 + $0xe8] sm:$0xff]  ;;  %v1215_v3 = vsel %vm215_vm0, %v207_v46, 0.0  ;;  %v1218_v6 = vsel %vm215_vm0, %v208_v47, 0.0  ;;  %v1222_v9 = vsel %vm215_vm0, %v209_v52, 0.0  ;;  %v288_v13 = vmul.f32 %v1113_v11, %v1113_v11 }
  0x24   : > { %v252_v30 = vadd.f32 %v251_v20, %v1130_v24  ;;  %v213_v60 = vld [vmem:[%s1093_s3 + $0xf0] sm:$0xff]  ;;  %v214_v61 = vld [vmem:[%s1093_s3 + $0xf8] sm:$0xff]  ;;  %v1225_v10 = vsel %vm215_vm0, %v210_v53, 0.0  ;;  %v1228_v12 = vsel %vm215_vm0, %v211_v54, 0.0  ;;  %v1233_v14 = vsel %vm215_vm0, %v212_v59, 0.0 }
  0x25   : > { %v1236_v15 = vsel %vm215_vm0, %v213_v60, 0.0  ;;  %v1239_v17 = vsel %vm215_vm0, %v214_v61, 0.0  ;;  %v289_v19 = vmul.f32 %v1120_v16, %v1120_v16  ;;  %v290_v20 = vmul.f32 %v1130_v24, %v1130_v24 }
  0x26   : > { %v253_v44 = vadd.f32 %v252_v30, %v1137_v28  ;;  %v317_v21 = vadd.f32 %v286_v51, %v285_v37  ;;  %v740_v22 = vpack.c.bf16 %v1102_v5, %v1099_v4  ;;  %v745_v25 = vpack.c.bf16 %v1113_v11, %v1108_v8 }
  0x27   : > { %v750_v26 = vpack.c.bf16 %v1130_v24, %v1120_v16  ;;  %v755_v4 = vpack.c.bf16 %v1140_v29, %v1137_v28  ;;  %v760_v27 = vpack.c.bf16 %v1150_v35, %v1147_v34  ;;  %v765_v30 = vpack.c.bf16 %v1161_v41, %v1153_v36 }
  0x28   : > { %v254_v58 = vadd.f32 %v253_v44, %v1140_v29  ;;  %v318_v5 = vadd.f32 %v317_v21, %v287_v1  ;;  %741 = vst [vmem:[%s1250_s5] sm:$0xff] %v740_v22   ;;  %v770_v8 = vpack.c.bf16 %v1167_v43, %v1164_v42  ;;  %817 = vst [vmem:[%s1250_s5 + $0x8] sm:$0xff] %v745_v25  }
  0x29   : > { %818 = vst [vmem:[%s1250_s5 + $0x10] sm:$0xff] %v750_v26   ;;  %819 = vst [vmem:[%s1250_s5 + $0x18] sm:$0xff] %v755_v4   ;;  %v775_v16 = vpack.c.bf16 %v1177_v49, %v1174_v48  ;;  %v780_v24 = vpack.c.bf16 %v1188_v55, %v1180_v50  ;;  %v785_v31 = vpack.c.bf16 %v1194_v57, %v1191_v56 }
  0x2a   : > { %v255_v7 = vadd.f32 %v254_v58, %v1147_v34  ;;  %v319_v32 = vadd.f32 %v318_v5, %v288_v13  ;;  %820 = vst [vmem:[%s1250_s5 + $0x20] sm:$0xff] %v760_v27   ;;  %821 = vst [vmem:[%s1250_s5 + $0x28] sm:$0xff] %v765_v30   ;;  %v790_v33 = vpack.c.bf16 %v1204_v63, %v1201_v62 }
  0x2b   : > { %822 = vst [vmem:[%s1250_s5 + $0x30] sm:$0xff] %v770_v8   ;;  %v795_v37 = vpack.c.bf16 %v1212_v2, %v1207_v0  ;;  %v800_v38 = vpack.c.bf16 %v1218_v6, %v1215_v3  ;;  %823 = vst [vmem:[%s1250_s5 + $0x38] sm:$0xff] %v775_v16   ;;  %v805_v40 = vpack.c.bf16 %v1225_v10, %v1222_v9 }
  0x2c   : > { %v256_v18 = vadd.f32 %v255_v7, %v1150_v35  ;;  %824 = vst [vmem:[%s1250_s5 + $0x40] sm:$0xff] %v780_v24   ;;  %825 = vst [vmem:[%s1250_s5 + $0x48] sm:$0xff] %v785_v31   ;;  %v810_v44 = vpack.c.bf16 %v1233_v14, %v1228_v12  ;;  %v815_v45 = vpack.c.bf16 %v1239_v17, %v1236_v15 }
  0x2d   : > { %v291_v46 = vmul.f32 %v1137_v28, %v1137_v28  ;;  %v320_v47 = vadd.f32 %v319_v32, %v289_v19  ;;  %826 = vst [vmem:[%s1250_s5 + $0x50] sm:$0xff] %v790_v33   ;;  %827 = vst [vmem:[%s1250_s5 + $0x58] sm:$0xff] %v795_v37   ;;  %v292_v52 = vmul.f32 %v1140_v29, %v1140_v29 }
  0x2e   : > { %v257_v23 = vadd.f32 %v256_v18, %v1153_v36  ;;  %828 = vst [vmem:[%s1250_s5 + $0x60] sm:$0xff] %v800_v38   ;;  %829 = vst [vmem:[%s1250_s5 + $0x68] sm:$0xff] %v805_v40  }
  0x2f   : > { %830 = vst [vmem:[%s1250_s5 + $0x70] sm:$0xff] %v810_v44   ;;  %831 = vst [vmem:[%s1250_s5 + $0x78] sm:$0xff] %v815_v45   ;;  %v321_v53 = vadd.f32 %v320_v47, %v290_v20 }
  0x30   : > { %v258_v11 = vadd.f32 %v257_v23, %v1161_v41 }
  0x32   : > { %v259_v39 = vadd.f32 %v258_v11, %v1164_v42 }
  0x34   : > { %v260_v51 = vadd.f32 %v259_v39, %v1167_v43 }
  0x35   : > { %908 = shalt.err (!%p905_p5)
}
  0x36   : > { %s909_s28 = scalar_lea.hbm %s1292_s15, 2048  ;;  %s913_s3 = scalar_lea.hbm %s1450_s2, 4096 }
  0x37   : > { %p910_p6 = scmp.ne.s32.totalorder %s1292_s15, %s909_s28  ;;  %p914_p10 = scmp.lt.s32.totalorder %s1292_s15, %s1450_s2 }
  0x38   : > { %p915_p11 = scmp.lt.s32.totalorder %s913_s3, %s909_s28 }
  0x39   : > { %p911_p7 = pnand %p910_p6, %p1063_p4 }
  0x3a   : > { %p916_p12 = por %p915_p11, %p914_p10 }
  0x3b   : > { %p912_p9 = pneg %p911_p7 }
  0x3d   : > { %p917_p13 = pnand %p916_p12, %p912_p9 }
  0x3f   : > { %920 = shalt.err (!%p917_p13)
}
  0x40   : > { %s1005_s7 = smov 64   ;;  %s1006_s8 = smov 4   ;;  %v261_v28 = vadd.f32 %v260_v51, %v1174_v48  ;;  %v293_v29 = vmul.f32 %v1147_v34, %v1147_v34  ;;  %v322_v54 = vadd.f32 %v321_v53, %v291_v46  ;;  %v294_v59 = vmul.f32 %v1150_v35, %v1150_v35 }
  0x41   : > { %833 = dma.vmem_to_hbm [thread:$0]  (%p1063_p4), %s1278_s6, 2048, %s1292_s15, %s526_s16, %s1005_s7, %s1005_s7, %s1006_s8   ;;  %v295_v1 = vmul.f32 %v1153_v36, %v1153_v36  ;;  %v296_v18 = vmul.f32 %v1161_v41, %v1161_v41  ;;  %v297_v20 = vmul.f32 %v1164_v42, %v1164_v42  ;;  %v298_v22 = vmul.f32 %v1167_v43, %v1167_v43 }
  0x42   : > { %v262_v58 = vadd.f32 %v261_v28, %v1177_v49  ;;  %v323_v60 = vadd.f32 %v322_v54, %v292_v52  ;;  %v299_v25 = vmul.f32 %v1174_v48, %v1174_v48  ;;  %v300_v4 = vmul.f32 %v1177_v49, %v1177_v49  ;;  %s539_s6 = sshll.u32 %s1085_s26, 4  ;;  %s537_s16 = scalar_lea.hbm %s1449_s1, %s1083_s25  ;;  %s540_s6 = int_to_ptr.vmem [resolvable:$true] %s539_s6 }
  0x43   : > { %v301_v27 = vmul.f32 %v1180_v50, %v1180_v50  ;;  %v302_v8 = vmul.f32 %v1188_v55, %v1188_v55  ;;  %v303_v16 = vmul.f32 %v1191_v56, %v1191_v56  ;;  %v304_v31 = vmul.f32 %v1194_v57, %v1194_v57  ;;  %s521_s18 = scalar_lea.sflag [#allocation3], %s1079_s23  ;;  %s921_s20 = scalar_lea.vmem %s540_s6, 32 }
  0x44   : > { %v263_v61 = vadd.f32 %v262_v58, %v1180_v50  ;;  %v324_v7 = vadd.f32 %v323_v60, %v293_v29  ;;  %v305_v33 = vmul.f32 %v1201_v62, %v1201_v62  ;;  %v306_v38 = vmul.f32 %v1204_v63, %v1204_v63  ;;  %p922_p0 = scmp.ne.s32.totalorder %s540_s6, %s921_s20  ;;  %s1007_s24 = smov [#allocation2]  }
  0x45   : > { %v307_v40 = vmul.f32 %v1207_v0, %v1207_v0  ;;  %v308_v45 = vmul.f32 %v1212_v2, %v1212_v2  ;;  %v309_v47 = vmul.f32 %v1215_v3, %v1215_v3  ;;  %v310_v52 = vmul.f32 %v1218_v6, %v1218_v6  ;;  %s925_s27 = sshll.u32 %s1007_s24, 4  ;;  %s926_s27 = int_to_ptr.vmem [resolvable:$false] %s925_s27 }
  0x46   : > { %v264_v13 = vadd.f32 %v263_v61, %v1188_v55  ;;  %v325_v19 = vadd.f32 %v324_v7, %v294_v59  ;;  %v311_v28 = vmul.f32 %v1222_v9, %v1222_v9  ;;  %v312_v54 = vmul.f32 %v1225_v10, %v1225_v10  ;;  %p923_p1 = pnand %p922_p0, %p1063_p4  ;;  %s927_s28 = scalar_lea.vmem %s926_s27, 64 }
  0x47   : > { %v313_v59 = vmul.f32 %v1228_v12, %v1228_v12  ;;  %p928_p3 = scmp.lt.s32.totalorder %s540_s6, %s926_s27  ;;  %p929_p5 = scmp.lt.s32.totalorder %s927_s28, %s921_s20 }
  0x48   : > { %v265_v34 = vadd.f32 %v264_v13, %v1191_v56  ;;  %v326_v21 = vadd.f32 %v325_v19, %v295_v1  ;;  %v315_v13 = vmul.f32 %v1236_v15, %v1236_v15  ;;  %v316_v19 = vmul.f32 %v1239_v17, %v1239_v17  ;;  %p924_p2 = pneg %p923_p1 }
  0x49   : > { %p930_p6 = por %p929_p5, %p928_p3 }
  0x4a   : > { %v266_v35 = vadd.f32 %v265_v34, %v1194_v57  ;;  %v327_v23 = vadd.f32 %v326_v21, %v296_v18 }
  0x4b   : > { %p931_p7 = pnand %p930_p6, %p924_p2 }
  0x4c   : > { %v267_v36 = vadd.f32 %v266_v35, %v1201_v62  ;;  %v328_v26 = vadd.f32 %v327_v23, %v297_v20 }
  0x4e   : > { %v268_v41 = vadd.f32 %v267_v36, %v1204_v63  ;;  %v329_v5 = vadd.f32 %v328_v26, %v298_v22 }
  0x50   : > { %v269_v42 = vadd.f32 %v268_v41, %v1207_v0  ;;  %v330_v30 = vadd.f32 %v329_v5, %v299_v25 }
  0x52   : > { %v270_v43 = vadd.f32 %v269_v42, %v1212_v2  ;;  %v331_v11 = vadd.f32 %v330_v30, %v300_v4 }
  0x54   : > { %v271_v48 = vadd.f32 %v270_v43, %v1215_v3  ;;  %v332_v24 = vadd.f32 %v331_v11, %v301_v27 }
  0x56   : > { %v272_v49 = vadd.f32 %v271_v48, %v1218_v6  ;;  %v333_v32 = vadd.f32 %v332_v24, %v302_v8  ;;  %v314_v6 = vmul.f32 %v1233_v14, %v1233_v14 }
  0x58   : > { %v273_v50 = vadd.f32 %v272_v49, %v1222_v9  ;;  %v334_v37 = vadd.f32 %v333_v32, %v303_v16  ;;  %v354_v9 = vld [vmem:[%s1085_s26] sm:$0x1] }
  0x5a   : > { %v274_v55 = vadd.f32 %v273_v50, %v1225_v10  ;;  %v335_v39 = vadd.f32 %v334_v37, %v304_v31 }
  0x5c   : > { %v275_v56 = vadd.f32 %v274_v55, %v1228_v12  ;;  %v336_v44 = vadd.f32 %v335_v39, %v305_v33 }
  0x5e   : > { %v276_v57 = vadd.f32 %v275_v56, %v1233_v14  ;;  %v337_v46 = vadd.f32 %v336_v44, %v306_v38 }
  0x60   : > { %v277_v62 = vadd.f32 %v276_v57, %v1236_v15  ;;  %v338_v51 = vadd.f32 %v337_v46, %v307_v40  ;;  %v357_v15 = vld [vmem:[%s1085_s26 + $0x1] sm:$0x1] }
  0x62   : > { %v278_v63 = vadd.f32 %v277_v62, %v1239_v17  ;;  %v339_v0 = vadd.f32 %v338_v51, %v308_v45 }
  0x64   : > { %v279_v53 = vrot.slane %v278_v63, 4  ;;  %v340_v29 = vadd.f32 %v339_v0, %v309_v47 }
  0x66   : > { %v280_v2 = vadd.f32 %v279_v53, %v278_v63  ;;  %v341_v58 = vadd.f32 %v340_v29, %v310_v52 }
  0x68   : > { %v281_v3 = vrot.slane %v280_v2, 2  ;;  %v342_v60 = vadd.f32 %v341_v58, %v311_v28 }
  0x6a   : > { %v282_v61 = vadd.f32 %v281_v3, %v280_v2  ;;  %v343_v1 = vadd.f32 %v342_v60, %v312_v54 }
  0x6c   : > { %v283_v7 = vrot.slane %v282_v61, 1  ;;  %v344_v10 = vadd.f32 %v343_v1, %v313_v59 }
  0x6e   : > { %v284_v18 = vadd.f32 %v283_v7, %v282_v61  ;;  %v345_v12 = vadd.f32 %v344_v10, %v314_v6 }
  0x70   : > { %v355_v34 = vadd.f32 %v354_v9, %v284_v18  ;;  %v346_v20 = vadd.f32 %v345_v12, %v315_v13 }
  0x72   : > { %356 = vst [vmem:[%s1085_s26] sm:$0x1] %v355_v34  ;;  %v347_v14 = vadd.f32 %v346_v20, %v316_v19 }
  0x74   : > { %v348_v21 = vrot.slane %v347_v14, 4 }
  0x76   : > { %v349_v35 = vadd.f32 %v348_v21, %v347_v14 }
  0x78   : > { %v350_v22 = vrot.slane %v349_v35, 2 }
  0x7a   : > { %v351_v23 = vadd.f32 %v350_v22, %v349_v35 }
  0x7c   : > { %v352_v36 = vrot.slane %v351_v23, 1 }
  0x7e   : > { %v353_v25 = vadd.f32 %v352_v36, %v351_v23 }
  0x80   : > { %v358_v26 = vadd.f32 %v357_v15, %v353_v25 }
  0x82   : > { %359 = vst [vmem:[%s1085_s26 + $0x1] sm:$0x1] %v358_v26 }
  0x83   : > { %934 = shalt.err (!%p931_p7)
}
  0x84   : > { %s935_s29 = scalar_lea.hbm %s537_s16, 32  ;;  %s939_s26 = scalar_lea.hbm %s1449_s1, 64 }
  0x85   : > { %p936_p9 = scmp.ne.s32.totalorder %s537_s16, %s935_s29  ;;  %p940_p12 = scmp.lt.s32.totalorder %s537_s16, %s1449_s1 }
  0x86   : > { %p941_p13 = scmp.lt.s32.totalorder %s939_s26, %s935_s29 }
  0x87   : > { %p937_p10 = pnand %p936_p9, %p1063_p4 }
  0x88   : > { %p942_p0 = por %p941_p13, %p940_p12 }
  0x89   : > { %p938_p11 = pneg %p937_p10 }
  0x8b   : > { %p943_p1 = pnand %p942_p0, %p938_p11 }
  0x8d   : > { %946 = shalt.err (!%p943_p1)
}
  0x8e   : > { %832 = dma.vmem_to_hbm [thread:$0]  (%p1063_p4), %s540_s6, 32, %s537_s16, %s521_s18  }
  0x8f PF: > { %p843_p2 = scmp.ge.s32.totalorder %s1001_s14, 2  ;;  %s568_s4 = sand.u32 1, %s981_s9  }
  0x90   : > { %s569_s5 = scalar_lea.sflag [#allocation3], %s568_s4 }
  0x91   : > { %p837_p3 = pnand %p843_p2, %p1070_p8 }
  0x93   : > { %p838_p5 = pneg %p837_p3 }
  0x95   : > { %972 = dma.done.wait (%p838_p5), %s569_s5, 32  }
  0x96   : > { %974 = vsyncadd (%p838_p5), %s569_s5, 4294967264  ;;  %s578_s7 = scalar_lea.sflag [#allocation5], %s568_s4 }
  0x97   : > { %976 = dma.done.wait (%p838_p5), %s578_s7, 2048  }
  0x98   : > { %978 = vsyncadd (%p838_p5), %s578_s7, 4294965248  ;;  %s19_s14 = sadd.s32 1, %s1001_s14   ;;  %s1453_s9 = smov %s985_s10 }
  0x99   : > { %p16_p6 = scmp.ge.s32.totalorder %s19_s14, 4   ;;  %s1454_s10 = smov %s989_s11 }
  0x9a   : > { %s1455_s11 = smov %s1076_s22  ;;  %s1456_s12 = smov %s997_s13 }
  0x9b   : > { %s1457_s13 = smov %s1459_s17  ;;  %18 = sbr.rel (!%p16_p6) target bundleno = 6 (0x6), region = 80 }
  0xa0   :  { %583 = vsyncpa [#allocation3], 1 }
  0xa1   :  { %585 = vsyncpa [#allocation3 + $0x1], 1 }
  0xa2   :  { %586 = vsyncpa [#allocation5], 1 }
  0xa3   :  { %588 = vsyncpa [#allocation5 + $0x1], 1 }

</bundles_post_ra>
